<compile_context>
chip_gen: v7x
topology: tpu7x:2x2x1
jax: 0.10.0
libtpu: 0.0.40
codegen_flags: <defaults>
</compile_context>

<pallas_src>
from functools import partial

import jax
import jax.numpy as jnp
from jax.experimental import pallas as pl
from jax.experimental.pallas import tpu as pltpu


def _global_pool_kernel(vals_ref, mask_ref, out_ref, acc_ref, cnt_ref,
                        *, mean: bool, n_total: int, block_n: int):
    """Grid: (b_blocks, d_blocks, n_steps).  Block shapes:
         vals_ref: (TB, TN, TD)      mask_ref: (TB, 1, TN) bool
         out_ref:  (TB, 1, TD)       acc_ref:  (TB, 1, TD) f32
         cnt_ref:  (TB, 1, 1)  f32
    """
    n = pl.program_id(2)

    @pl.when(n == 0)
    def _init():
        acc_ref[...] = jnp.zeros_like(acc_ref)
        cnt_ref[...] = jnp.zeros_like(cnt_ref)

    vals = vals_ref[...]                                       # (TB, TN, TD)
    m = mask_ref[...].astype(jnp.float32)                      # (TB, 1, TN)

    if n_total % block_n != 0:
        # Ragged last tile: zero BOTH the out-of-range mask lanes and the
        # out-of-range vals rows.  The padded region of the vals block is
        # unspecified data (NaN in interpret mode), and 0 * NaN = NaN would
        # otherwise poison the accumulator.
        start = n * block_n
        lane_pos = jax.lax.broadcasted_iota(jnp.int32, m.shape, 2) + start
        m = jnp.where(lane_pos < n_total, m, 0.0)
        row_pos = jax.lax.broadcasted_iota(jnp.int32, vals.shape, 1) + start
        vals = jnp.where(row_pos < n_total, vals, 0)

    # Masked sum as one batched MXU contraction, accumulated in f32.
    acc_ref[...] += jnp.einsum('bkn,bnd->bkd', m.astype(vals.dtype), vals,
                               preferred_element_type=jnp.float32)

    if mean:
        cnt_ref[...] += jnp.sum(m, axis=2, keepdims=True)      # exact f32 count

    @pl.when(n == pl.num_programs(2) - 1)
    def _finalize():
        if mean:
            # Exact 1-element reciprocal (off the DMA-bound critical path);
            # a fully-masked row gives NaN, matching the reference's 0/0.
            inv = 1.0 / cnt_ref[...]
            out_ref[...] = (acc_ref[...] * inv).astype(out_ref.dtype)
        else:
            out_ref[...] = acc_ref[...].astype(out_ref.dtype)


def _round_up(x: int, m: int) -> int:
    return ((x + m - 1) // m) * m


def _pick_tiles(B: int, N: int, D: int, itemsize: int,
                budget_bytes: int = 2 * 1024 * 1024):
    """Pick (TB, TN, TD) so the vals block stays ~<= budget_bytes.

    Constraints: TD == D or multiple of 128; TN == N or multiple of 128
    (mask lane axis); TB <= B.  ~2 MiB per (double-buffered) vals slab is
    past the HBM-roofline knee on v5e/v6e/v7x while keeping total VMEM small.
    """
    # Feature tile.
    if D <= 128 or 128 * D * itemsize <= budget_bytes:
        td = D
    else:
        td = max(128, (budget_bytes // (128 * itemsize) // 128) * 128)
        td = min(td, (D // 128) * 128)
    # Reduction tile.
    rows = budget_bytes // max(1, td * itemsize)
    tn = N if rows >= N else max(128, (rows // 128) * 128)
    # Batch tile.
    tb = max(1, min(B, budget_bytes // max(1, tn * td * itemsize)))
    # v7x has 2 TensorCores: keep >= 2 parallel grid blocks when possible.
    if B >= 2 and pl.cdiv(D, td) < 2:
        tb = min(tb, -(-B // 2))
    return tb, tn, td


def _vmem_limit_bytes(tb: int, tn: int, td: int, itemsize: int) -> int:
    """Scoped-VMEM limit derived from the actual working set (+ headroom)."""
    p_tn = _round_up(tn, 16)
    p_td = _round_up(td, 128)
    vals_b = 2 * tb * p_tn * p_td * itemsize            # double-buffered input
    mask_b = 2 * tb * 8 * _round_up(tn, 128)            # bool, padded
    out_b = 2 * tb * 8 * p_td * itemsize                # double-buffered output
    acc_b = tb * 8 * p_td * 4
    cnt_b = tb * 8 * 128 * 4
    ws = vals_b + mask_b + out_b + acc_b + cnt_b
    return max(16 << 20, min(int(1.5 * ws) + (1 << 20), 64 << 20))


def global_pool(coords, vals, mask, *, mean: bool = False,
                block_b=None, block_n=None, block_d=None):
    """coords: (B, N, C) (unused by GlobalPool's output, kept for interface parity)
       vals:   (B, N, D)
       mask:   (B, N) bool or None
       returns (B, D)"""
    del coords  # not used by GlobalPool.forward output
    if mask is None:
        # Original module hits `val.mean(dim=1)` (a NameError bug); intended
        # semantics are a plain mean over dim=1 — no mask hot path, handled
        # in plain JAX (bypasses the Pallas kernel).
        return jnp.mean(vals, axis=1)

    B, N, D = vals.shape
    itemsize = jnp.dtype(vals.dtype).itemsize

    auto_tb, auto_tn, auto_td = _pick_tiles(B, N, D, itemsize)
    TB = block_b if block_b is not None else auto_tb
    TN = block_n if block_n is not None else auto_tn
    TD = block_d if block_d is not None else auto_td
    assert TN == N or TN % 128 == 0, \
        "block_n must equal N or be a multiple of 128 (mask lane constraint)"
    assert TD == D or TD % 128 == 0, \
        "block_d must equal D or be a multiple of 128 (lane constraint)"
    TB = max(1, min(TB, B))

    b_blocks = pl.cdiv(B, TB)
    d_blocks = pl.cdiv(D, TD)
    n_steps = pl.cdiv(N, TN)

    # Lane-dense bool mask layout; no dtype cast on the host side.
    mask3 = mask.reshape(B, 1, N)

    cost = pl.CostEstimate(
        flops=2 * B * N * D,
        transcendentals=0,
        bytes_accessed=B * N * D * itemsize + B * N + B * D * itemsize,
    )

    # TODO(synk): for D < 128 with D | 128, lane-fold g=128/D reduction rows
    # into the feature axis to densify vregs / the output store (secondary
    # win; the kernel is HBM-bound and TB batch blocking is the main fix).
    out = pl.pallas_call(
        partial(_global_pool_kernel, mean=mean, n_total=N, block_n=TN),
        out_shape=jax.ShapeDtypeStruct((B, 1, D), vals.dtype),
        grid=(b_blocks, d_blocks, n_steps),
        in_specs=[
            pl.BlockSpec((TB, TN, TD), lambda b, d, n: (b, n, d)),
            pl.BlockSpec((TB, 1, TN), lambda b, d, n: (b, 0, n)),
        ],
        out_specs=pl.BlockSpec((TB, 1, TD), lambda b, d, n: (b, 0, d)),
        scratch_shapes=[
            pltpu.VMEM((TB, 1, TD), jnp.float32),   # f32 sum accumulator
            pltpu.VMEM((TB, 1, 1), jnp.float32),    # f32 valid-count accumulator
        ],
        compiler_params=pltpu.CompilerParams(
            dimension_semantics=("parallel", "parallel", "arbitrary"),
            vmem_limit_bytes=_vmem_limit_bytes(TB, TN, TD, itemsize),
        ),
        cost_estimate=cost,
    )(vals, mask3)
    return out.reshape(B, D)


def _reference(vals, mask, mean):
    masked = jnp.where(mask[..., None], vals, 0.0)
    summed = masked.sum(axis=1)
    if not mean:
        return summed
    count = mask.sum(axis=-1, keepdims=True).astype(vals.dtype)
    return summed / count


if __name__ == "__main__":
    key = jax.random.PRNGKey(0)
    k1, k2, k3, k4, k5, k6, k7 = jax.random.split(key, 7)

    # Case 1: small module-like shapes, single tile per batch block.
    B, N, D, C = 2, 8, 32, 3
    coords = jax.random.normal(k1, (B, N, C), dtype=jnp.float32)
    vals = jax.random.normal(k2, (B, N, D), dtype=jnp.float32)
    mask = jax.random.uniform(k3, (B, N)) > 0.3
    mask = mask.at[:, 0].set(True)  # at least one valid element per row

    out_sum = jax.block_until_ready(global_pool(coords, vals, mask, mean=False))
    out_mean = jax.block_until_ready(global_pool(coords, vals, mask, mean=True))
    assert out_sum.shape == (B, D) and out_mean.shape == (B, D)
    assert jnp.allclose(out_sum, _reference(vals, mask, False), atol=1e-4, rtol=1e-4)
    assert jnp.allclose(out_mean, _reference(vals, mask, True), atol=1e-4, rtol=1e-4)

    # Case 2: tiled + ragged N reduction (N % block_n != 0).
    B2, N2, D2 = 2, 200, 128
    vals2 = jax.random.normal(k4, (B2, N2, D2), dtype=jnp.float32)
    mask2 = jax.random.uniform(k5, (B2, N2)) > 0.5
    mask2 = mask2.at[:, 0].set(True)

    out2_sum = jax.block_until_ready(
        global_pool(None, vals2, mask2, mean=False, block_n=128))
    out2_mean = jax.block_until_ready(
        global_pool(None, vals2, mask2, mean=True, block_n=128))
    assert jnp.allclose(out2_sum, _reference(vals2, mask2, False), atol=1e-3, rtol=1e-3)
    assert jnp.allclose(out2_mean, _reference(vals2, mask2, True), atol=1e-3, rtol=1e-3)

    # Case 3: multi-row batch blocks with a ragged batch block (B % block_b != 0).
    B3, N3, D3 = 3, 16, 64
    vals3 = jax.random.normal(k6, (B3, N3, D3), dtype=jnp.float32)
    maskc = jax.random.uniform(k7, (B3, N3)) > 0.4
    maskc = maskc.at[:, 0].set(True)

    out3_sum = jax.block_until_ready(
        global_pool(None, vals3, maskc, mean=False, block_b=2))
    out3_mean = jax.block_until_ready(
        global_pool(None, vals3, maskc, mean=True, block_b=2))
    assert jnp.allclose(out3_sum, _reference(vals3, maskc, False), atol=1e-4, rtol=1e-4)
    assert jnp.allclose(out3_mean, _reference(vals3, maskc, True), atol=1e-4, rtol=1e-4)

    print("KERNEL_OK")
</pallas_src>

<mosaic_0001>
module attributes {stable_mosaic.version = 11 : i64} {
  func.func @_global_pool_kernel(%arg0: i32, %arg1: i32, %arg2: i32, %arg3: memref<1x8x32xf32, #tpu.memory_space<vmem>>, %arg4: memref<1x1x8xi32, #tpu.memory_space<vmem>>, %arg5: memref<1x1x32xf32, #tpu.memory_space<vmem>>, %arg6: memref<1x1x32xf32, #tpu.memory_space<vmem>>, %arg7: memref<1x1x1xf32, #tpu.memory_space<vmem>>) attributes {dimension_semantics = [#tpu.dimension_semantics<parallel>, #tpu.dimension_semantics<parallel>, #tpu.dimension_semantics<arbitrary>], iteration_bounds = array<i64: 2, 1, 1>, scalar_prefetch = 0 : i64, scratch_operands = 2 : i64, tpu.core_type = #tpu.core_type<tc>, window_params = [{transform_indices = @transform_0, window_bounds = array<i64: 1, 8, 32>}, {transform_indices = @transform_1, window_bounds = array<i64: 1, 1, 8>}, {transform_indices = @transform_2, window_bounds = array<i64: 1, 1, 32>}]} {
    %c0_i32 = arith.constant 0 : i32
    %0 = arith.cmpi eq, %arg2, %c0_i32 : i32
    %1 = arith.extui %0 : i1 to i32
    %c0_i32_0 = arith.constant 0 : i32
    %2 = arith.cmpi ne, %1, %c0_i32_0 : i32
    scf.if %2 {
      %cst_15 = arith.constant 0.000000e+00 : f32
      %15 = vector.broadcast %cst_15 : f32 to vector<1x1x32xf32>
      %c0_16 = arith.constant 0 : index
      %c0_17 = arith.constant 0 : index
      %c0_18 = arith.constant 0 : index
      %16 = vector.load %arg6[%c0_16, %c0_17, %c0_18] : memref<1x1x32xf32, #tpu.memory_space<vmem>>, vector<1x1x32xf32>
      tpu.vector_store %arg6[%c0_16, %c0_17, %c0_18], %15 {strides = array<i32>} : memref<1x1x32xf32, #tpu.memory_space<vmem>>, vector<1x1x32xf32>,
      %cst_19 = arith.constant 0.000000e+00 : f32
      %17 = vector.broadcast %cst_19 : f32 to vector<1x1x1xf32>
      %c0_20 = arith.constant 0 : index
      %c0_21 = arith.constant 0 : index
      %c0_22 = arith.constant 0 : index
      %18 = vector.load %arg7[%c0_20, %c0_21, %c0_22] : memref<1x1x1xf32, #tpu.memory_space<vmem>>, vector<1x1x1xf32>
      tpu.vector_store %arg7[%c0_20, %c0_21, %c0_22], %17 {strides = array<i32>} : memref<1x1x1xf32, #tpu.memory_space<vmem>>, vector<1x1x1xf32>,
    } else {
    }
    %c0 = arith.constant 0 : index
    %c0_1 = arith.constant 0 : index
    %c0_2 = arith.constant 0 : index
    %3 = vector.load %arg3[%c0, %c0_1, %c0_2] : memref<1x8x32xf32, #tpu.memory_space<vmem>>, vector<1x8x32xf32>
    %c0_3 = arith.constant 0 : index
    %c0_4 = arith.constant 0 : index
    %c0_5 = arith.constant 0 : index
    %4 = vector.load %arg4[%c0_3, %c0_4, %c0_5] : memref<1x1x8xi32, #tpu.memory_space<vmem>>, vector<1x1x8xi32>
    %cst = arith.constant dense<0> : vector<1x1x8xi32>
    %5 = arith.cmpi ne, %4, %cst : vector<1x1x8xi32>
    %6 = arith.extui %5 : vector<1x1x8xi1> to vector<1x1x8xi32>
    %7 = arith.sitofp %6 : vector<1x1x8xi32> to vector<1x1x8xf32>
    %c0_6 = arith.constant 0 : index
    %c0_7 = arith.constant 0 : index
    %c0_8 = arith.constant 0 : index
    %8 = vector.load %arg6[%c0_6, %c0_7, %c0_8] : memref<1x1x32xf32, #tpu.memory_space<vmem>>, vector<1x1x32xf32>
    "tpu.trace_start"() <{level = 10 : i32, message = "bkn,bnd->bkd"}> : () -> ()
    %cst_9 = arith.constant dense<0.000000e+00> : vector<1x1x32xf32>
    %9 = tpu.matmul %7, %3, %cst_9 {dimension_numbers = #tpu.dot_dimension_numbers<[2], [1], [1], [2], [0, 0, 0, 1, 1, 2], [0], [0]>} : vector<1x1x8xf32>, vector<1x8x32xf32>, vector<1x1x32xf32> -> vector<1x1x32xf32>
    "tpu.trace_stop"() : () -> ()
    %10 = arith.addf %8, %9 : vector<1x1x32xf32>
    %c0_10 = arith.constant 0 : index
    %c0_11 = arith.constant 0 : index
    %c0_12 = arith.constant 0 : index
    %11 = vector.load %arg6[%c0_10, %c0_11, %c0_12] : memref<1x1x32xf32, #tpu.memory_space<vmem>>, vector<1x1x32xf32>
    tpu.vector_store %arg6[%c0_10, %c0_11, %c0_12], %10 {strides = array<i32>} : memref<1x1x32xf32, #tpu.memory_space<vmem>>, vector<1x1x32xf32>,
    %c0_i32_13 = arith.constant 0 : i32
    %12 = arith.cmpi eq, %arg2, %c0_i32_13 : i32
    %13 = arith.extui %12 : i1 to i32
    %c0_i32_14 = arith.constant 0 : i32
    %14 = arith.cmpi ne, %13, %c0_i32_14 : i32
    scf.if %14 {
      %c0_15 = arith.constant 0 : index
      %c0_16 = arith.constant 0 : index
      %c0_17 = arith.constant 0 : index
      %15 = vector.load %arg6[%c0_15, %c0_16, %c0_17] : memref<1x1x32xf32, #tpu.memory_space<vmem>>, vector<1x1x32xf32>
      %c0_18 = arith.constant 0 : index
      %c0_19 = arith.constant 0 : index
      %c0_20 = arith.constant 0 : index
      %16 = vector.load %arg5[%c0_18, %c0_19, %c0_20] : memref<1x1x32xf32, #tpu.memory_space<vmem>>, vector<1x1x32xf32>
      tpu.vector_store %arg5[%c0_18, %c0_19, %c0_20], %15 {strides = array<i32>} : memref<1x1x32xf32, #tpu.memory_space<vmem>>, vector<1x1x32xf32>,
    } else {
    }
    return
  }
  func.func @transform_0(%arg0: i32, %arg1: i32, %arg2: i32) -> (i32, i32, i32) {
    %c0_i32 = arith.constant 0 : i32
    return %arg0, %arg2, %arg1 : i32, i32, i32
  }
  func.func @transform_1(%arg0: i32, %arg1: i32, %arg2: i32) -> (i32, i32, i32) {
    %c0_i32 = arith.constant 0 : i32
    %c0_i32_0 = arith.constant 0 : i32
    return %arg0, %c0_i32, %arg2 : i32, i32, i32
  }
  func.func @transform_2(%arg0: i32, %arg1: i32, %arg2: i32) -> (i32, i32, i32) {
    %c0_i32 = arith.constant 0 : i32
    %c0_i32_0 = arith.constant 0 : i32
    return %arg0, %c0_i32, %arg1 : i32, i32, i32
  }
}

</mosaic_0001>

<bundles_post_ra>
// kernel: tpu_custom_call.1
= control target key start
LH: loop header
LB: loop body
LE: loop exit
PB: predicated region body
PF: predicated region fallthrough
CT: control target
= control target key end

     0   :  { %7 = vsyncpa [#allocation5], 0  ;;  %s810_s0 = inlined_call_operand.hbm [shape: f32[2,8,32], index: 0, kind: input, shape index: {}]   ;;  %s811_s1 = inlined_call_operand.vmem [shape: s32[2,1,8], index: 1, kind: input, shape index: {}]   ;;  %s812_s2 = inlined_call_operand.hbm [shape: f32[2,1,32], index: 2, kind: output, shape index: {}]  }
   0x1   :  { %9 = vsyncpa [#allocation5 + $0x1], 0 }
   0x2   :  { %10 = vsyncpa [#allocation6], 0 }
   0x3   :  { %12 = vsyncpa [#allocation6 + $0x1], 0  ;;  %s629_s9 = smov 0   ;;  %s631_s10 = smov 0  }
   0x4   :  { %s633_s11 = smov 0   ;;  %s635_s12 = smov 0  }
   0x5   :  { %s637_s13 = smov 0   ;;  %s639_s14 = smov 0  }
   0x6 LB: > { %s412_s15 = sadd.s32 4294967295, %s608_s14   ;;  %s413_s16 = sadd.s32 4294967294, %s608_s14   ;;  %s608_s14 = sphi %s639_s14, %s18_s14   ;;  %s604_s13 = sphi %s637_s13, %s828_s13   ;;  %s600_s12 = sphi %s635_s12, %s827_s12   ;;  %s596_s11 = sphi %s633_s11, %s826_s11   ;;  %s592_s10 = sphi %s631_s10, %s825_s10   ;;  %s588_s9 = sphi %s629_s9, %s824_s9  }
   0x7   : > { %s37_s17 = sadd.s32 1, %s604_s13  ;;  %s48_s18 = sadd.s32 1, %s596_s11 }
   0x8   : > { %p39_p0 = scmp.ge.s32.totalorder %s37_s17, 2  ;;  %p55_p1 = scmp.ne.s32.totalorder %s596_s11, %s592_s10 }
   0x9   : > { %p56_p2 = scmp.eq.s32.totalorder %s608_s14, 0  ;;  %p61_p3 = scmp.ne.s32.totalorder %s592_s10, %s588_s9 }
   0xa   : > { %s830_s17 = smov (%p39_p0, %s37_s17), 0  ;;  %p62_p5 = scmp.eq.s32.totalorder %s412_s15, 0 }
   0xb   : > { %p670_p4 = por %p56_p2, %p55_p1  ;;  %s41_s20 = ssub.s32 %s604_s13, %s830_s17 }
   0xc   : > { %p115_p6 = scmp.eq.s32.totalorder %s412_s15, 1  ;;  %p46_p7 = scmp.eq.s32.totalorder %s41_s20, 0 }
   0xd   : > { %p676_p8 = por %p62_p5, %p61_p3  ;;  %p121_p10 = scmp.eq.s32.totalorder %s413_s16, 1 }
   0xe   : > { %p680_p9 = por %p115_p6, %p55_p1  ;;  %p444_p13 = scmp.lt.s32.totalorder %s608_s14, 2 }
   0xf   : > { %s685_s23 = scalar_select %p46_p7, %s596_s11, %s48_s18  }
  0x10   : > { %s816_s22 = scalar_select %p680_p9, 1, 0 }
  0x11   : > { %p687_p11 = por %p121_p10, %p61_p3  ;;  %s141_s25 = sand.u32 1, %s596_s11  }
  0x12   : > { %s416_s26 = sshll.u32 %s141_s25, 3  ;;  %s417_s27 = sshll.u32 %s604_s13, 7 }
  0x13   : > { %s817_s24 = scalar_select %p687_p11, 1, 0 }
  0x14   : > { %s698_s30 = scalar_lea.hbm %s810_s0, %s417_s27  ;;  %s145_s3 = scalar_lea.vmem [#allocation4], %s416_s26 }
  0x15   : > { %s154_s4 = sshll.u32 %s145_s3, 4  ;;  %p704_p0 = pnand %p444_p13, %p670_p4  ;;  %s700_s4 = int_to_ptr.vmem [resolvable:$true] %s154_s4 }
  0x16   : > { %s142_s6 = scalar_lea.sflag [#allocation5], %s141_s25  ;;  %s496_s7 = scalar_lea.hbm %s698_s30, 128 }
  0x17   : > { %p497_p3 = scmp.ne.s32.totalorder %s698_s30, %s496_s7  ;;  %p498_p5 = pneg %p704_p0 }
  0x18   : > { %s501_s16 = scalar_lea.hbm %s810_s0, 256  ;;  %p502_p4 = scmp.lt.u32.totalorder %s698_s30, %s810_s0 }
  0x19   : > { %p499_p6 = pnand %p498_p5, %p497_p3  ;;  %p503_p10 = scmp.lt.u32.totalorder %s501_s16, %s496_s7 }
  0x1a   : > { %p505_p12 = scmp.lt.u32.totalorder %s496_s7, %s698_s30 }
  0x1b   : > { %p500_p7 = pneg %p499_p6  ;;  %p504_p13 = por %p503_p10, %p502_p4 }
  0x1d   : > { %p506_p1 = por %p505_p12, %p504_p13 }
  0x1f   : > { %p507_p2 = pnand %p506_p1, %p500_p7 }
  0x21   : > { %510 = shalt.err (!%p507_p2)
}
  0x22   : > { %s511_s20 = scalar_lea.vmem %s700_s4, 128  ;;  %s610_s25 = smov [#allocation4]  }
  0x23   : > { %p512_p3 = scmp.ne.s32.totalorder %s700_s4, %s511_s20  ;;  %s516_s26 = sshll.u32 %s610_s25, 4  ;;  %s517_s26 = int_to_ptr.vmem [resolvable:$false] %s516_s26 }
  0x24   : > { %s518_s27 = scalar_lea.vmem %s517_s26, 256  ;;  %p519_p9 = scmp.lt.s32.totalorder %s700_s4, %s517_s26 }
  0x25   : > { %p514_p6 = pnand %p512_p3, %p498_p5  ;;  %p520_p4 = scmp.lt.s32.totalorder %s518_s27, %s511_s20 }
  0x27   : > { %p515_p11 = pneg %p514_p6  ;;  %p521_p10 = por %p520_p4, %p519_p9 }
  0x29   : > { %p522_p12 = pnand %p521_p10, %p515_p11 }
  0x2b   : > { %525 = shalt.err (!%p522_p12)
}
  0x2c   : > { %439 = dma.hbm_to_vmem [thread:$0]  (!%p704_p0), %s698_s30, 128, %s700_s4, %s142_s6  }
  0x2d   : > { %p819_p1 = scmp.lt.s32.totalorder %s608_s14, 3  ;;  %p820_p2 = scmp.ge.s32.totalorder %s608_s14, 1 }
  0x2f   : > { %p169_p5 = pnand %p820_p2, %p819_p1 }
  0x30   : > { %s740_s28 = sand.u32 (!%p169_p5), 1, %s592_s10  }
  0x31   : > { %172 = sbr.rel (%p169_p5) target bundleno = 301 (0x12d), region = 28  ;;  %s419_s29 = sshll.u32 (!%p169_p5), %s740_s28, 3 }
  0x32   : > { %s175_s3 = scalar_lea.sflag (!%p169_p5), [#allocation5], %s740_s28  ;;  %s178_s7 = scalar_lea.vmem (!%p169_p5), [#allocation4], %s419_s29 }
  0x38   : > { %579 = dma.done.wait (%p676_p8), %s175_s3, 128  }
  0x39   : > { %581 = vsyncadd (%p676_p8), %s175_s3, 4294967168  ;;  %p204_p9 = scmp.lt.s32.totalorder %s600_s12, 1  ;;  %v611_v0 = vmov 0.0   ;;  %vm612_vm0 = vmmov 0   ;;  %vm214_vm1 = vcmask 253952   ;;  %v218_v1 = vld [vmem:[%s178_s7] sm:$0xff] }
  0x3a   : > { %427 = vmatprep.subr.mxu0 %v611_v0  ;;  %429 = vmatprep.mubr.msk.f32.mxu0 %vm612_vm0, %v611_v0  ;;  %215 = vst.msk [vmem:[#allocation2] sm:$0x1] %vm214_vm1, %v611_v0  ;;  %vm224_vm2 = vcmask 64512   ;;  %s422_s21 = sshll.u32 %s600_s12, 4  ;;  %s203_s8 = scalar_lea.vmem [#allocation7], %s740_s28 }
  0x3b   : > { %s205_s30 = scalar_select %p204_p9, %s600_s12, 1  ;;  %428 = vmatpush3.msra.mxu0 %v218_v1 }
  0x3c   : > { %s320_s15 = sshll.u32 %s203_s8, 4  ;;  %s760_s19 = scalar_lea.hbm %s812_s2, %s422_s21  ;;  %s762_s15 = int_to_ptr.vmem [resolvable:$true] %s320_s15 }
  0x3d   : > { %s209_s6 = scalar_lea.vmem %s811_s1, %s205_s30  ;;  %s307_s20 = scalar_lea.sflag [#allocation6], %s740_s28 }
  0x3e   : > { %v219_v2 = vld [vmem:[%s209_s6] sm:$0x1]  ;;  %s526_s25 = scalar_lea.vmem %s762_s15, 16  ;;  %p821_p11 = scmp.ne.s32.totalorder %s816_s22, 0 }
  0x3f   : > { %vm220_vm3 = vcmp.ne.s32.totalorder %v219_v2, 0  ;;  %p527_p8 = scmp.ne.s32.totalorder %s762_s15, %s526_s25  ;;  %s613_s12 = smov [#allocation7]  }
  0x40   : > { %v420_v3 = vsel %vm220_vm3, 1.0, %v611_v0  ;;  %s530_s26 = sshll.u32 %s613_s12, 4  ;;  %s531_s26 = int_to_ptr.vmem [resolvable:$false] %s530_s26 }
  0x41   : > { %430 = vmatmul.mubr.msk.f32.vlgmr.msra.gmra.mrb[0].mxu0 %vm224_vm2, %v420_v3  ;;  %v223_v4 = vld [vmem:[#allocation2] sm:$0x1]  ;;  %p528_p0 = pnand %p527_p8, %p821_p11  ;;  %s532_s27 = scalar_lea.vmem %s531_s26, 32 }
  0x42   : > { %p533_p13 = scmp.lt.s32.totalorder %s762_s15, %s531_s26  ;;  %p534_p3 = scmp.lt.s32.totalorder %s532_s27, %s526_s25 }
  0x43   : > { %p529_p7 = pneg %p528_p0 }
  0x44   : > { %p535_p6 = por %p534_p3, %p533_p13 }
  0x46   : > { %p536_p4 = pnand %p535_p6, %p529_p7 }
 0x114   : > { %v294_v5 = vpop.f32.mrb[0].mxu0 }
 0x115   : > { %v298_v6 = vadd.f32 %v294_v5, %v223_v4  ;;  %v431_v7 = vpop.f32.mrb[1].mxu0 }
 0x117   : > { %300 = vst.msk [vmem:[#allocation2] sm:$0x1] %vm214_vm1, %v298_v6 }
 0x11e   : > { %v304_v8 = vld [vmem:[#allocation2] sm:$0x1] }
 0x11f   : > { %305 = vst.msk [vmem:[%s203_s8] sm:$0x1] %vm214_vm1, %v304_v8 }
 0x120   : > { %539 = shalt.err (!%p536_p4)
}
 0x121   : > { %s540_s28 = scalar_lea.hbm %s760_s19, 16  ;;  %s544_s7 = scalar_lea.hbm %s812_s2, 32 }
 0x122   : > { %p541_p10 = scmp.ne.s32.totalorder %s760_s19, %s540_s28  ;;  %p545_p2 = scmp.lt.u32.totalorder %s760_s19, %s812_s2 }
 0x123   : > { %p546_p5 = scmp.lt.u32.totalorder %s544_s7, %s540_s28  ;;  %p548_p8 = scmp.lt.u32.totalorder %s540_s28, %s760_s19 }
 0x124   : > { %p542_p12 = pnand %p541_p10, %p821_p11 }
 0x125   : > { %p547_p9 = por %p546_p5, %p545_p2 }
 0x126   : > { %p543_p1 = pneg %p542_p12 }
 0x127   : > { %p549_p0 = por %p548_p8, %p547_p9 }
 0x129   : > { %p550_p7 = pnand %p549_p0, %p543_p1 }
 0x12b   : > { %553 = shalt.err (!%p550_p7)
}
 0x12c   : > { %434 = dma.vmem_to_hbm [thread:$0]  (%p821_p11), %s762_s15, 16, %s760_s19, %s307_s20  }
 0x12d PF: > { %s332_s5 = sand.u32 1, %s588_s9   ;;  %p822_p13 = scmp.ne.s32.totalorder %s817_s24, 0 }
 0x12e   : > { %p823_p3 = scmp.ge.s32.totalorder %s608_s14, 2  ;;  %s333_s6 = scalar_lea.sflag [#allocation6], %s332_s5 }
 0x130   : > { %p441_p6 = pnand %p823_p3, %p822_p13 }
 0x132   : > { %583 = dma.done.wait (!%p441_p6), %s333_s6, 16  }
 0x133   : > { %585 = vsyncadd (!%p441_p6), %s333_s6, 4294967280  ;;  %s18_s14 = sadd.s32 1, %s608_s14   ;;  %s824_s9 = smov %s592_s10 }
 0x134   : > { %p15_p4 = scmp.ge.s32.totalorder %s18_s14, 4   ;;  %s825_s10 = smov %s596_s11 }
 0x135   : > { %s826_s11 = smov %s685_s23  ;;  %s827_s12 = smov %s604_s13 }
 0x136   : > { %s828_s13 = smov %s830_s17  ;;  %17 = sbr.rel (!%p15_p4) target bundleno = 6 (0x6), region = 84 }
 0x13d   :  { %337 = vsyncpa [#allocation5], 1 }
 0x13e   :  { %339 = vsyncpa [#allocation5 + $0x1], 1 }
 0x13f   :  { %340 = vsyncpa [#allocation6], 1 }
 0x140   :  { %342 = vsyncpa [#allocation6 + $0x1], 1 }

</bundles_post_ra>
